<compile_context>
chip_gen: v6e
topology: v6e:2x2x1
jax: 0.10.0
libtpu: 0.0.40
codegen_flags: <defaults>
</compile_context>

<pallas_src>
import jax
import jax.numpy as jnp
from jax.experimental import pallas as pl
from jax.experimental.pallas import tpu as pltpu


def _make_fused_kernel(row_tile: int, context_size: int, emb_dim: int):
    """Build the fused gather + MLP + log_softmax kernel for a given row tile."""

    def kernel(tok_ref, emb_ref, w1_ref, b1_ref, w2_ref, b2_ref, o_ref):
        # tok_ref: SMEM (B, C) int32      scalar-prefetched token ids
        # emb_ref: VMEM (V, 1, E)         embedding table (leading dim dyn-indexed)
        # w1_ref:  (E*C, H)   b1_ref: (1, H)
        # w2_ref:  (H, V)     b2_ref: (1, V)
        # o_ref:   (row_tile, V)          log-probabilities for this row tile
        row0 = pl.program_id(0) * row_tile

        w1 = w1_ref[...]  # (E*C, H) loaded once per grid step

        # Linear1 decomposed over context positions:
        #   h = b1 + sum_c  emb[tok[:, c]] @ W1[c*E:(c+1)*E, :]
        acc = None
        for c in range(context_size):
            rows = [emb_ref[tok_ref[row0 + r, c]] for r in range(row_tile)]  # (1, E) each
            e_c = rows[0] if row_tile == 1 else jnp.concatenate(rows, axis=0)  # (TM, E)
            part = jnp.dot(
                e_c,
                w1[c * emb_dim:(c + 1) * emb_dim, :],
                preferred_element_type=jnp.float32,
            )
            acc = part if acc is None else acc + part

        h = jnp.maximum(acc + b1_ref[...], 0.0)  # ReLU, (TM, H)

        logits = (
            jnp.dot(h, w2_ref[...], preferred_element_type=jnp.float32) + b2_ref[...]
        )  # (TM, V)

        # Numerically stable log_softmax over the vocab (lane) axis.
        m = jnp.max(logits, axis=-1, keepdims=True)
        shifted = logits - m
        lse = jnp.log(jnp.sum(jnp.exp(shifted), axis=-1, keepdims=True))
        o_ref[...] = shifted - lse

    return kernel


def generate_model_forward_batched(tokens, emb_table, w1, b1, w2, b2):
    """tokens: (B, context_size) int32 -> (B, vocab_size) float32 log-probs."""
    tokens = tokens.astype(jnp.int32)
    batch, context_size = tokens.shape
    vocab, emb_dim = emb_table.shape
    in_dim, hidden = w1.shape
    assert in_dim == emb_dim * context_size

    # Row tile: 8 (one sublane group) when the batch allows it, else 1 row.
    row_tile = 8 if batch % 8 == 0 else 1
    assert batch % row_tile == 0
    grid = (batch // row_tile,)

    emb3 = emb_table.reshape(vocab, 1, emb_dim).astype(jnp.float32)
    kernel = _make_fused_kernel(row_tile, context_size, emb_dim)

    grid_spec = pltpu.PrefetchScalarGridSpec(
        num_scalar_prefetch=1,          # tokens -> SMEM, passed to index_maps + kernel
        grid=grid,
        in_specs=[
            pl.BlockSpec((vocab, 1, emb_dim), lambda i, toks: (0, 0, 0)),  # emb table
            pl.BlockSpec((in_dim, hidden), lambda i, toks: (0, 0)),        # W1 resident
            pl.BlockSpec((1, hidden), lambda i, toks: (0, 0)),             # b1
            pl.BlockSpec((hidden, vocab), lambda i, toks: (0, 0)),         # W2 resident
            pl.BlockSpec((1, vocab), lambda i, toks: (0, 0)),              # b2
        ],
        out_specs=pl.BlockSpec((row_tile, vocab), lambda i, toks: (i, 0)),
    )

    return pl.pallas_call(
        kernel,
        out_shape=jax.ShapeDtypeStruct((batch, vocab), jnp.float32),
        grid_spec=grid_spec,
        compiler_params=pltpu.CompilerParams(dimension_semantics=("parallel",)),
    )(
        tokens,
        emb3,
        w1.astype(jnp.float32),
        b1.reshape(1, -1).astype(jnp.float32),
        w2.astype(jnp.float32),
        b2.reshape(1, -1).astype(jnp.float32),
    )


def generate_model_forward(tokens, emb_table, w1, b1, w2, b2):
    """Module-faithful forward: tokens (context_size,) -> (1, vocab_size) log-probs."""
    return generate_model_forward_batched(
        tokens.reshape(1, -1), emb_table, w1, b1, w2, b2
    )


def _reference_forward(tokens2d, emb_table, w1, b1, w2, b2):
    b = tokens2d.shape[0]
    x = emb_table[tokens2d].reshape(b, -1)
    h = jnp.maximum(x @ w1 + b1, 0.0)
    logits = h @ w2 + b2
    return jax.nn.log_softmax(logits, axis=-1)


if __name__ == "__main__":
    vocab_size = 256
    embedding_dims = 16
    context_size = 8
    hidden = 128

    key = jax.random.PRNGKey(0)
    k_emb, k_w1, k_b1, k_w2, k_b2, k_tok, k_btok = jax.random.split(key, 7)

    # PyTorch Linear weight is (out, in); we store the transpose (in, out).
    emb_table = jax.random.normal(k_emb, (vocab_size, embedding_dims), jnp.float32) * 0.1
    w1 = jax.random.normal(k_w1, (embedding_dims * context_size, hidden), jnp.float32) * 0.05
    b1 = jax.random.normal(k_b1, (hidden,), jnp.float32) * 0.01
    w2 = jax.random.normal(k_w2, (hidden, vocab_size), jnp.float32) * 0.05
    b2 = jax.random.normal(k_b2, (vocab_size,), jnp.float32) * 0.01

    # 1) Module-faithful single-context forward: (C,) -> (1, V).
    tokens = jax.random.randint(k_tok, (context_size,), 0, vocab_size, jnp.int32)
    out = jax.block_until_ready(
        generate_model_forward(tokens, emb_table, w1, b1, w2, b2)
    )
    ref = _reference_forward(tokens.reshape(1, -1), emb_table, w1, b1, w2, b2)
    assert out.shape == (1, vocab_size)
    assert jnp.max(jnp.abs(out - ref)) < 5e-4, "single-context mismatch vs reference"

    # 2) Batched path (many contexts per call; row-tiled grid, weights VMEM-resident).
    batch = 16
    tokens_b = jax.random.randint(k_btok, (batch, context_size), 0, vocab_size, jnp.int32)
    out_b = jax.block_until_ready(
        generate_model_forward_batched(tokens_b, emb_table, w1, b1, w2, b2)
    )
    ref_b = _reference_forward(tokens_b, emb_table, w1, b1, w2, b2)
    assert out_b.shape == (batch, vocab_size)
    assert jnp.max(jnp.abs(out_b - ref_b)) < 5e-4, "batched mismatch vs reference"

    print("KERNEL_OK")
</pallas_src>

<mosaic_0001>
module attributes {stable_mosaic.version = 11 : i64} {
  func.func @kernel(%arg0: i32, %arg1: memref<1x8xi32, #tpu.memory_space<smem>>, %arg2: memref<256x1x16xf32, #tpu.memory_space<vmem>>, %arg3: memref<128x128xf32, #tpu.memory_space<vmem>>, %arg4: memref<1x128xf32, #tpu.memory_space<vmem>>, %arg5: memref<128x256xf32, #tpu.memory_space<vmem>>, %arg6: memref<1x256xf32, #tpu.memory_space<vmem>>, %arg7: memref<1x256xf32, #tpu.memory_space<vmem>>) attributes {dimension_semantics = [#tpu.dimension_semantics<parallel>], iteration_bounds = array<i64: 1>, scalar_prefetch = 1 : i64, scratch_operands = 0 : i64, tpu.core_type = #tpu.core_type<tc>, window_params = [{pipeline_mode = #tpu.pipeline_mode<synchronous>, transform_indices = @transform_0, window_bounds = array<i64: 256, 1, 16>}, {pipeline_mode = #tpu.pipeline_mode<synchronous>, transform_indices = @transform_1, window_bounds = array<i64: 128, 128>}, {pipeline_mode = #tpu.pipeline_mode<synchronous>, transform_indices = @transform_2, window_bounds = array<i64: 1, 128>}, {pipeline_mode = #tpu.pipeline_mode<synchronous>, transform_indices = @transform_3, window_bounds = array<i64: 128, 256>}, {pipeline_mode = #tpu.pipeline_mode<synchronous>, transform_indices = @transform_4, window_bounds = array<i64: 1, 256>}, {transform_indices = @transform_5, window_bounds = array<i64: 1, 256>}]} {
    %c1_i32 = arith.constant 1 : i32
    %0 = arith.muli %arg0, %c1_i32 : i32
    %c0 = arith.constant 0 : index
    %c0_0 = arith.constant 0 : index
    %1 = vector.load %arg3[%c0, %c0_0] : memref<128x128xf32, #tpu.memory_space<vmem>>, vector<128x128xf32>
    %c0_i32 = arith.constant 0 : i32
    %2 = arith.addi %0, %c0_i32 : i32
    %3 = arith.index_cast %2 : i32 to index
    %c0_1 = arith.constant 0 : index
    %4 = memref.load %arg1[%3, %c0_1] : memref<1x8xi32, #tpu.memory_space<smem>>
    %5 = arith.index_cast %4 : i32 to index
    %c0_2 = arith.constant 0 : index
    %c0_3 = arith.constant 0 : index
    %6 = vector.load %arg2[%5, %c0_2, %c0_3] : memref<256x1x16xf32, #tpu.memory_space<vmem>>, vector<1x1x16xf32>
    %7 = vector.shape_cast %6 : vector<1x1x16xf32> to vector<1x16xf32>
    %8 = vector.extract_strided_slice %1 {offsets = [0, 0], sizes = [16, 128], strides = [1, 1]} : vector<128x128xf32> to vector<16x128xf32>
    %cst = arith.constant dense<0.000000e+00> : vector<1x128xf32>
    %9 = tpu.matmul %7, %8, %cst {dimension_numbers = #tpu.dot_dimension_numbers<[1], [0], [0], [1], [0, 0, 1, 1], [], []>} : vector<1x16xf32>, vector<16x128xf32>, vector<1x128xf32> -> vector<1x128xf32>
    %c0_i32_4 = arith.constant 0 : i32
    %10 = arith.addi %0, %c0_i32_4 : i32
    %11 = arith.index_cast %10 : i32 to index
    %c1 = arith.constant 1 : index
    %12 = memref.load %arg1[%11, %c1] : memref<1x8xi32, #tpu.memory_space<smem>>
    %13 = arith.index_cast %12 : i32 to index
    %c0_5 = arith.constant 0 : index
    %c0_6 = arith.constant 0 : index
    %14 = vector.load %arg2[%13, %c0_5, %c0_6] : memref<256x1x16xf32, #tpu.memory_space<vmem>>, vector<1x1x16xf32>
    %15 = vector.shape_cast %14 : vector<1x1x16xf32> to vector<1x16xf32>
    %16 = vector.extract_strided_slice %1 {offsets = [16, 0], sizes = [16, 128], strides = [1, 1]} : vector<128x128xf32> to vector<16x128xf32>
    %cst_7 = arith.constant dense<0.000000e+00> : vector<1x128xf32>
    %17 = tpu.matmul %15, %16, %cst_7 {dimension_numbers = #tpu.dot_dimension_numbers<[1], [0], [0], [1], [0, 0, 1, 1], [], []>} : vector<1x16xf32>, vector<16x128xf32>, vector<1x128xf32> -> vector<1x128xf32>
    %18 = arith.addf %9, %17 : vector<1x128xf32>
    %c0_i32_8 = arith.constant 0 : i32
    %19 = arith.addi %0, %c0_i32_8 : i32
    %20 = arith.index_cast %19 : i32 to index
    %c2 = arith.constant 2 : index
    %21 = memref.load %arg1[%20, %c2] : memref<1x8xi32, #tpu.memory_space<smem>>
    %22 = arith.index_cast %21 : i32 to index
    %c0_9 = arith.constant 0 : index
    %c0_10 = arith.constant 0 : index
    %23 = vector.load %arg2[%22, %c0_9, %c0_10] : memref<256x1x16xf32, #tpu.memory_space<vmem>>, vector<1x1x16xf32>
    %24 = vector.shape_cast %23 : vector<1x1x16xf32> to vector<1x16xf32>
    %25 = vector.extract_strided_slice %1 {offsets = [32, 0], sizes = [16, 128], strides = [1, 1]} : vector<128x128xf32> to vector<16x128xf32>
    %cst_11 = arith.constant dense<0.000000e+00> : vector<1x128xf32>
    %26 = tpu.matmul %24, %25, %cst_11 {dimension_numbers = #tpu.dot_dimension_numbers<[1], [0], [0], [1], [0, 0, 1, 1], [], []>} : vector<1x16xf32>, vector<16x128xf32>, vector<1x128xf32> -> vector<1x128xf32>
    %27 = arith.addf %18, %26 : vector<1x128xf32>
    %c0_i32_12 = arith.constant 0 : i32
    %28 = arith.addi %0, %c0_i32_12 : i32
    %29 = arith.index_cast %28 : i32 to index
    %c3 = arith.constant 3 : index
    %30 = memref.load %arg1[%29, %c3] : memref<1x8xi32, #tpu.memory_space<smem>>
    %31 = arith.index_cast %30 : i32 to index
    %c0_13 = arith.constant 0 : index
    %c0_14 = arith.constant 0 : index
    %32 = vector.load %arg2[%31, %c0_13, %c0_14] : memref<256x1x16xf32, #tpu.memory_space<vmem>>, vector<1x1x16xf32>
    %33 = vector.shape_cast %32 : vector<1x1x16xf32> to vector<1x16xf32>
    %34 = vector.extract_strided_slice %1 {offsets = [48, 0], sizes = [16, 128], strides = [1, 1]} : vector<128x128xf32> to vector<16x128xf32>
    %cst_15 = arith.constant dense<0.000000e+00> : vector<1x128xf32>
    %35 = tpu.matmul %33, %34, %cst_15 {dimension_numbers = #tpu.dot_dimension_numbers<[1], [0], [0], [1], [0, 0, 1, 1], [], []>} : vector<1x16xf32>, vector<16x128xf32>, vector<1x128xf32> -> vector<1x128xf32>
    %36 = arith.addf %27, %35 : vector<1x128xf32>
    %c0_i32_16 = arith.constant 0 : i32
    %37 = arith.addi %0, %c0_i32_16 : i32
    %38 = arith.index_cast %37 : i32 to index
    %c4 = arith.constant 4 : index
    %39 = memref.load %arg1[%38, %c4] : memref<1x8xi32, #tpu.memory_space<smem>>
    %40 = arith.index_cast %39 : i32 to index
    %c0_17 = arith.constant 0 : index
    %c0_18 = arith.constant 0 : index
    %41 = vector.load %arg2[%40, %c0_17, %c0_18] : memref<256x1x16xf32, #tpu.memory_space<vmem>>, vector<1x1x16xf32>
    %42 = vector.shape_cast %41 : vector<1x1x16xf32> to vector<1x16xf32>
    %43 = vector.extract_strided_slice %1 {offsets = [64, 0], sizes = [16, 128], strides = [1, 1]} : vector<128x128xf32> to vector<16x128xf32>
    %cst_19 = arith.constant dense<0.000000e+00> : vector<1x128xf32>
    %44 = tpu.matmul %42, %43, %cst_19 {dimension_numbers = #tpu.dot_dimension_numbers<[1], [0], [0], [1], [0, 0, 1, 1], [], []>} : vector<1x16xf32>, vector<16x128xf32>, vector<1x128xf32> -> vector<1x128xf32>
    %45 = arith.addf %36, %44 : vector<1x128xf32>
    %c0_i32_20 = arith.constant 0 : i32
    %46 = arith.addi %0, %c0_i32_20 : i32
    %47 = arith.index_cast %46 : i32 to index
    %c5 = arith.constant 5 : index
    %48 = memref.load %arg1[%47, %c5] : memref<1x8xi32, #tpu.memory_space<smem>>
    %49 = arith.index_cast %48 : i32 to index
    %c0_21 = arith.constant 0 : index
    %c0_22 = arith.constant 0 : index
    %50 = vector.load %arg2[%49, %c0_21, %c0_22] : memref<256x1x16xf32, #tpu.memory_space<vmem>>, vector<1x1x16xf32>
    %51 = vector.shape_cast %50 : vector<1x1x16xf32> to vector<1x16xf32>
    %52 = vector.extract_strided_slice %1 {offsets = [80, 0], sizes = [16, 128], strides = [1, 1]} : vector<128x128xf32> to vector<16x128xf32>
    %cst_23 = arith.constant dense<0.000000e+00> : vector<1x128xf32>
    %53 = tpu.matmul %51, %52, %cst_23 {dimension_numbers = #tpu.dot_dimension_numbers<[1], [0], [0], [1], [0, 0, 1, 1], [], []>} : vector<1x16xf32>, vector<16x128xf32>, vector<1x128xf32> -> vector<1x128xf32>
    %54 = arith.addf %45, %53 : vector<1x128xf32>
    %c0_i32_24 = arith.constant 0 : i32
    %55 = arith.addi %0, %c0_i32_24 : i32
    %56 = arith.index_cast %55 : i32 to index
    %c6 = arith.constant 6 : index
    %57 = memref.load %arg1[%56, %c6] : memref<1x8xi32, #tpu.memory_space<smem>>
    %58 = arith.index_cast %57 : i32 to index
    %c0_25 = arith.constant 0 : index
    %c0_26 = arith.constant 0 : index
    %59 = vector.load %arg2[%58, %c0_25, %c0_26] : memref<256x1x16xf32, #tpu.memory_space<vmem>>, vector<1x1x16xf32>
    %60 = vector.shape_cast %59 : vector<1x1x16xf32> to vector<1x16xf32>
    %61 = vector.extract_strided_slice %1 {offsets = [96, 0], sizes = [16, 128], strides = [1, 1]} : vector<128x128xf32> to vector<16x128xf32>
    %cst_27 = arith.constant dense<0.000000e+00> : vector<1x128xf32>
    %62 = tpu.matmul %60, %61, %cst_27 {dimension_numbers = #tpu.dot_dimension_numbers<[1], [0], [0], [1], [0, 0, 1, 1], [], []>} : vector<1x16xf32>, vector<16x128xf32>, vector<1x128xf32> -> vector<1x128xf32>
    %63 = arith.addf %54, %62 : vector<1x128xf32>
    %c0_i32_28 = arith.constant 0 : i32
    %64 = arith.addi %0, %c0_i32_28 : i32
    %65 = arith.index_cast %64 : i32 to index
    %c7 = arith.constant 7 : index
    %66 = memref.load %arg1[%65, %c7] : memref<1x8xi32, #tpu.memory_space<smem>>
    %67 = arith.index_cast %66 : i32 to index
    %c0_29 = arith.constant 0 : index
    %c0_30 = arith.constant 0 : index
    %68 = vector.load %arg2[%67, %c0_29, %c0_30] : memref<256x1x16xf32, #tpu.memory_space<vmem>>, vector<1x1x16xf32>
    %69 = vector.shape_cast %68 : vector<1x1x16xf32> to vector<1x16xf32>
    %70 = vector.extract_strided_slice %1 {offsets = [112, 0], sizes = [16, 128], strides = [1, 1]} : vector<128x128xf32> to vector<16x128xf32>
    %cst_31 = arith.constant dense<0.000000e+00> : vector<1x128xf32>
    %71 = tpu.matmul %69, %70, %cst_31 {dimension_numbers = #tpu.dot_dimension_numbers<[1], [0], [0], [1], [0, 0, 1, 1], [], []>} : vector<1x16xf32>, vector<16x128xf32>, vector<1x128xf32> -> vector<1x128xf32>
    %72 = arith.addf %63, %71 : vector<1x128xf32>
    %c0_32 = arith.constant 0 : index
    %c0_33 = arith.constant 0 : index
    %73 = vector.load %arg4[%c0_32, %c0_33] : memref<1x128xf32, #tpu.memory_space<vmem>>, vector<1x128xf32>
    %74 = arith.addf %72, %73 : vector<1x128xf32>
    %cst_34 = arith.constant 0.000000e+00 : f32
    %75 = vector.broadcast %cst_34 : f32 to vector<1x128xf32>
    %76 = arith.maximumf %74, %75 : vector<1x128xf32>
    %c0_35 = arith.constant 0 : index
    %c0_36 = arith.constant 0 : index
    %77 = vector.load %arg5[%c0_35, %c0_36] : memref<128x256xf32, #tpu.memory_space<vmem>>, vector<128x256xf32>
    %cst_37 = arith.constant dense<0.000000e+00> : vector<1x256xf32>
    %78 = tpu.matmul %76, %77, %cst_37 {dimension_numbers = #tpu.dot_dimension_numbers<[1], [0], [0], [1], [0, 0, 1, 1], [], []>} : vector<1x128xf32>, vector<128x256xf32>, vector<1x256xf32> -> vector<1x256xf32>
    %c0_38 = arith.constant 0 : index
    %c0_39 = arith.constant 0 : index
    %79 = vector.load %arg6[%c0_38, %c0_39] : memref<1x256xf32, #tpu.memory_space<vmem>>, vector<1x256xf32>
    %80 = arith.addf %78, %79 : vector<1x256xf32>
    %cst_40 = arith.constant dense<0xFF800000> : vector<1xf32>
    %81 = vector.multi_reduction <maximumf>, %80, %cst_40 [1] : vector<1x256xf32> to vector<1xf32>
    %82 = vector.shape_cast %81 : vector<1xf32> to vector<1x1xf32>
    %83 = vector.broadcast %82 : vector<1x1xf32> to vector<1x256xf32>
    %84 = arith.subf %80, %83 : vector<1x256xf32>
    %85 = math.exp %84 : vector<1x256xf32>
    %cst_41 = arith.constant dense<0.000000e+00> : vector<1xf32>
    %86 = vector.multi_reduction <add>, %85, %cst_41 [1] : vector<1x256xf32> to vector<1xf32>
    %87 = vector.shape_cast %86 : vector<1xf32> to vector<1x1xf32>
    %88 = math.log %87 : vector<1x1xf32>
    %89 = vector.broadcast %88 : vector<1x1xf32> to vector<1x256xf32>
    %90 = arith.subf %84, %89 : vector<1x256xf32>
    %c0_42 = arith.constant 0 : index
    %c0_43 = arith.constant 0 : index
    %91 = vector.load %arg7[%c0_42, %c0_43] : memref<1x256xf32, #tpu.memory_space<vmem>>, vector<1x256xf32>
    tpu.vector_store %arg7[%c0_42, %c0_43], %90 {strides = array<i32>} : memref<1x256xf32, #tpu.memory_space<vmem>>, vector<1x256xf32>,
    return
  }
  func.func @transform_0(%arg0: i32, %arg1: memref<1x8xi32, #tpu.memory_space<smem>>) -> (i32, i32, i32) {
    %c0_i32 = arith.constant 0 : i32
    %c0_i32_0 = arith.constant 0 : i32
    %c0_i32_1 = arith.constant 0 : i32
    %c0_i32_2 = arith.constant 0 : i32
    return %c0_i32, %c0_i32_0, %c0_i32_1 : i32, i32, i32
  }
  func.func @transform_1(%arg0: i32, %arg1: memref<1x8xi32, #tpu.memory_space<smem>>) -> (i32, i32) {
    %c0_i32 = arith.constant 0 : i32
    %c0_i32_0 = arith.constant 0 : i32
    %c0_i32_1 = arith.constant 0 : i32
    return %c0_i32, %c0_i32_0 : i32, i32
  }
  func.func @transform_2(%arg0: i32, %arg1: memref<1x8xi32, #tpu.memory_space<smem>>) -> (i32, i32) {
    %c0_i32 = arith.constant 0 : i32
    %c0_i32_0 = arith.constant 0 : i32
    %c0_i32_1 = arith.constant 0 : i32
    return %c0_i32, %c0_i32_0 : i32, i32
  }
  func.func @transform_3(%arg0: i32, %arg1: memref<1x8xi32, #tpu.memory_space<smem>>) -> (i32, i32) {
    %c0_i32 = arith.constant 0 : i32
    %c0_i32_0 = arith.constant 0 : i32
    %c0_i32_1 = arith.constant 0 : i32
    return %c0_i32, %c0_i32_0 : i32, i32
  }
  func.func @transform_4(%arg0: i32, %arg1: memref<1x8xi32, #tpu.memory_space<smem>>) -> (i32, i32) {
    %c0_i32 = arith.constant 0 : i32
    %c0_i32_0 = arith.constant 0 : i32
    %c0_i32_1 = arith.constant 0 : i32
    return %c0_i32, %c0_i32_0 : i32, i32
  }
  func.func @transform_5(%arg0: i32, %arg1: memref<1x8xi32, #tpu.memory_space<smem>>) -> (i32, i32) {
    %c0_i32 = arith.constant 0 : i32
    %c0_i32_0 = arith.constant 0 : i32
    return %arg0, %c0_i32 : i32, i32
  }
}

</mosaic_0001>

<bundles_post_ra>
// kernel: tpu_custom_call.1
= control target key start
LH: loop header
LB: loop body
LE: loop exit
PB: predicated region body
PF: predicated region fallthrough
CT: control target
= control target key end

     0   :  { %s1265_s0 = inlined_call_operand.vmem [shape: s32[1,8], index: 0, kind: input, shape index: {}]   ;;  %s1266_s1 = inlined_call_operand.vmem [shape: f32[256,1,16], index: 1, kind: input, shape index: {}]   ;;  %s1267_s2 = inlined_call_operand.hbm [shape: f32[128,128], index: 2, kind: input, shape index: {}]   ;;  %s1268_s3 = inlined_call_operand.vmem [shape: f32[1,128], index: 3, kind: input, shape index: {}]   ;;  %s1269_s4 = inlined_call_operand.vmem [shape: f32[128,256], index: 4, kind: input, shape index: {}]   ;;  %s1270_s5 = inlined_call_operand.vmem [shape: f32[1,256], index: 5, kind: input, shape index: {}]   ;;  %s1271_s6 = inlined_call_operand.hbm [shape: f32[1,256], index: 6, kind: output, shape index: {}]  }
   0x1   :  { %s11_s23 = sshll.u32 %s1265_s0, 4  ;;  %s12_s23 = int_to_ptr.vmem [resolvable:$true] %s11_s23 }
   0x2   :  { %s975_s24 = scalar_lea.vmem %s12_s23, 16  ;;  %p980_p1 = scmp.lt.s32.totalorder %s12_s23, %s12_s23 }
   0x3   :  { %p976_p0 = scmp.ne.s32.totalorder %s12_s23, %s975_s24  ;;  %p981_p2 = scmp.lt.s32.totalorder %s975_s24, %s975_s24 }
   0x5   :  { %p982_p3 = por %p981_p2, %p980_p1 }
   0x7   :  { %p983_p4 = pnand %p982_p3, %p976_p0 }
   0x9   :  { %986 = shalt.err (!%p983_p4)  }
   0xa   :  { %s1033_s25 = smov [#allocation3]  }
   0xb   :  { %14 = dma.vmem_to_smem %s12_s23, 16, %s1033_s25, [#allocation2] }
   0xc   :  { %1027 = dma.done.wait [#allocation2], 16 }
   0xd   :  { %1028 = vsyncadd [#allocation2], 4294967280 }
   0xe   :  { %16 = sfence }
   0xf   :  { %17 = vsyncpa [#allocation5], 0 }
  0x10   :  { %18 = vsyncpa [#allocation6], 0  ;;  %s1034_s26 = smov [#allocation4]  }
  0x11   :  { %s26_s27 = sshll.u32 %s1034_s26, 4  ;;  %s27_s27 = int_to_ptr.vmem [resolvable:$true] %s26_s27 }
  0x12   :  { %s995_s28 = scalar_lea.vmem %s27_s27, 2048  ;;  %p1000_p6 = scmp.lt.s32.totalorder %s27_s27, %s27_s27 }
  0x13   :  { %p996_p5 = scmp.ne.s32.totalorder %s27_s27, %s995_s28  ;;  %p1001_p7 = scmp.lt.s32.totalorder %s995_s28, %s995_s28 }
  0x15   :  { %p1002_p8 = por %p1001_p7, %p1000_p6 }
  0x17   :  { %p1003_p9 = pnand %p1002_p8, %p996_p5 }
  0x19   :  { %1006 = shalt.err (!%p1003_p9)
}
  0x1a   :  { %s1035_s0 = smov 128   ;;  %s1036_s29 = smov 8  }
  0x1b   :  { %32 = dma.hbm_to_vmem [thread:$0]  %s1267_s2, 2048, %s27_s27, [#allocation5], %s1035_s0, %s1035_s0, %s1036_s29  }
  0x1c   :  { %1029 = dma.done.wait [#allocation5], 2048  }
  0x1d   :  { %1030 = vsyncadd [#allocation5], 4294965248  ;;  %v1037_v0 = vmov 0.0   ;;  %vm1038_vm0 = vmmov 0   ;;  %s866_s8 = sld [smem:[#allocation3 + $0x1]]  ;;  %v45_v1 = vld [vmem:[#allocation4 + $0x18] sm:$0xff] }
  0x1e   :  { %905 = vmatprep.subr.mxu1 %v1037_v0  ;;  %909 = vmatprep.mubr.msk.f32.mxu1 %vm1038_vm0, %v1037_v0  ;;  %s59_s9 = sld [smem:[#allocation3]]  ;;  %v44_v2 = vld [vmem:[#allocation4 + $0x10] sm:$0xff]  ;;  %vm66_vm1 = vcmask 130048   ;;  %v43_v4 = vld [vmem:[#allocation4 + $0x8] sm:$0xff]  ;;  %v42_v5 = vld [vmem:[#allocation4] sm:$0xff]  ;;  %vm799_vm2 = vcmask 1040384  }
  0x1f   :  { %792 = vmatprep.mubr.f32.mxu0 %v1037_v0  ;;  %s869_s10 = sld [smem:[#allocation3 + $0x2]]  ;;  %906 = vmatpush3.msra.mxu1 %v45_v1  ;;  %v47_v7 = vld [vmem:[#allocation4 + $0x28] sm:$0xff]  ;;  %v46_v8 = vld [vmem:[#allocation4 + $0x20] sm:$0xff]  ;;  %v49_v10 = vld [vmem:[#allocation4 + $0x38] sm:$0xff] }
  0x20   :  { %907 = vmatprep.subr.mxu1 %v1037_v0  ;;  %s1093_s16 = sld [smem:[#allocation3 + $0x3]]  ;;  %v48_v11 = vld [vmem:[#allocation4 + $0x30] sm:$0xff]  ;;  %v51_v13 = vld [vmem:[#allocation4 + $0x48] sm:$0xff]  ;;  %v50_v14 = vld [vmem:[#allocation4 + $0x40] sm:$0xff] }
  0x21   :  { %908 = vmatpush3.msra.mxu1 %v44_v2  ;;  %s1103_s20 = sld [smem:[#allocation3 + $0x4]]  ;;  %v53_v16 = vld [vmem:[#allocation4 + $0x58] sm:$0xff]  ;;  %v52_v17 = vld [vmem:[#allocation4 + $0x50] sm:$0xff]  ;;  %v55_v19 = vld [vmem:[#allocation4 + $0x68] sm:$0xff] }
  0x22   :  { %912 = vmatprep.subr.mxu1 %v1037_v0  ;;  %s1114_s24 = sld [smem:[#allocation3 + $0x5]]  ;;  %v54_v20 = vld [vmem:[#allocation4 + $0x60] sm:$0xff]  ;;  %v57_v22 = vld [vmem:[#allocation4 + $0x78] sm:$0xff]  ;;  %v56_v23 = vld [vmem:[#allocation4 + $0x70] sm:$0xff] }
  0x23   :  { %s64_s2 = scalar_lea.vmem %s1266_s1, %s866_s8  ;;  %s877_s28 = sld [smem:[#allocation3 + $0x6]]  ;;  %v715_v25 = vld [vmem:[%s1269_s4 + $0xf8] sm:$0xff]  ;;  %v714_v26 = vld [vmem:[%s1269_s4 + $0xf0] sm:$0xff]  ;;  %v713_v27 = vld [vmem:[%s1269_s4 + $0xe8] sm:$0xff] }
  0x24   :  { %v65_v3 = vld [vmem:[%s64_s2] sm:$0x1]  ;;  %s60_s15 = scalar_lea.vmem %s1266_s1, %s59_s9  ;;  %s879_s7 = sld [smem:[#allocation3 + $0x7]]  ;;  %728 = vmatprep.subr.mxu0 %v715_v25  ;;  %v711_v29 = vld [vmem:[%s1269_s4 + $0xd8] sm:$0xff]  ;;  %v710_v30 = vld [vmem:[%s1269_s4 + $0xd0] sm:$0xff] }
  0x25   :  { %910 = vmatmul.mubr.msk.f32.vlgmr.msra.gmra.mxu1 %vm66_vm1, %v65_v3  ;;  %v61_v6 = vld [vmem:[%s60_s15] sm:$0x1]  ;;  %s215_s19 = scalar_lea.vmem %s1266_s1, %s869_s10  ;;  %729 = vmatpush1.msra.mxu0 %v714_v26  ;;  %v709_v31 = vld [vmem:[%s1269_s4 + $0xc8] sm:$0xff]  ;;  %v707_v33 = vld [vmem:[%s1269_s4 + $0xb8] sm:$0xff] }
  0x26   :  { %913 = vmatpush3.msra.mxu1 %v43_v4  ;;  %916 = vmatprep.mubr.msk.f32.mxu1 %vm1038_vm0, %v1037_v0  ;;  %v216_v9 = vld [vmem:[%s215_s19] sm:$0x1]  ;;  %s293_s23 = scalar_lea.vmem %s1266_s1, %s1093_s16  ;;  %v706_v34 = vld [vmem:[%s1269_s4 + $0xb0] sm:$0xff]  ;;  %v705_v35 = vld [vmem:[%s1269_s4 + $0xa8] sm:$0xff] }
  0x27   :  { %914 = vmatprep.subr.mxu1 %v1037_v0  ;;  %v294_v12 = vld [vmem:[%s293_s23] sm:$0x1]  ;;  %s371_s27 = scalar_lea.vmem %s1266_s1, %s1103_s20  ;;  %730 = vmatprep.subr.mxu0 %v713_v27  ;;  %v703_v37 = vld [vmem:[%s1269_s4 + $0x98] sm:$0xff]  ;;  %v702_v38 = vld [vmem:[%s1269_s4 + $0x90] sm:$0xff] }
  0x28   :  { %915 = vmatpush3.msra.mxu1 %v42_v5  ;;  %v372_v15 = vld [vmem:[%s371_s27] sm:$0x1]  ;;  %s449_s30 = scalar_lea.vmem %s1266_s1, %s1114_s24  ;;  %v701_v39 = vld [vmem:[%s1269_s4 + $0x88] sm:$0xff]  ;;  %v699_v41 = vld [vmem:[%s1269_s4 + $0x78] sm:$0xff] }
  0x29   :  { %917 = vmatmul.mubr.msk.f32.vlgmr.msra.gmra.mxu1 %vm66_vm1, %v61_v6  ;;  %919 = vmatprep.subr.mxu1 %v1037_v0  ;;  %v450_v18 = vld [vmem:[%s449_s30] sm:$0x1]  ;;  %s527_s10 = scalar_lea.vmem %s1266_s1, %s877_s28  ;;  %v698_v42 = vld [vmem:[%s1269_s4 + $0x70] sm:$0xff]  ;;  %v697_v43 = vld [vmem:[%s1269_s4 + $0x68] sm:$0xff] }
  0x2a   :  { %920 = vmatpush3.msra.mxu1 %v47_v7  ;;  %923 = vmatprep.mubr.msk.f32.mxu1 %vm1038_vm0, %v1037_v0  ;;  %v528_v21 = vld [vmem:[%s527_s10] sm:$0x1]  ;;  %s605_s2 = scalar_lea.vmem %s1266_s1, %s879_s7  ;;  %v695_v45 = vld [vmem:[%s1269_s4 + $0x58] sm:$0xff]  ;;  %v694_v46 = vld [vmem:[%s1269_s4 + $0x50] sm:$0xff] }
  0x2b   :  { %921 = vmatprep.subr.mxu1 %v1037_v0  ;;  %v606_v24 = vld [vmem:[%s605_s2] sm:$0x1]  ;;  %v693_v47 = vld [vmem:[%s1269_s4 + $0x48] sm:$0xff]  ;;  %v691_v49 = vld [vmem:[%s1269_s4 + $0x38] sm:$0xff] }
  0x2c   :  { %922 = vmatpush3.msra.mxu1 %v46_v8  ;;  %v712_v28 = vld [vmem:[%s1269_s4 + $0xe0] sm:$0xff]  ;;  %v690_v50 = vld [vmem:[%s1269_s4 + $0x30] sm:$0xff]  ;;  %v689_v51 = vld [vmem:[%s1269_s4 + $0x28] sm:$0xff] }
  0x2d   :  { %924 = vmatmul.mubr.msk.f32.vlgmr.msra.gmra.mxu1 %vm66_vm1, %v216_v9  ;;  %926 = vmatprep.subr.mxu1 %v1037_v0  ;;  %v708_v32 = vld [vmem:[%s1269_s4 + $0xc0] sm:$0xff]  ;;  %v687_v53 = vld [vmem:[%s1269_s4 + $0x18] sm:$0xff]  ;;  %v686_v54 = vld [vmem:[%s1269_s4 + $0x10] sm:$0xff] }
  0x2e   :  { %927 = vmatpush3.msra.mxu1 %v49_v10  ;;  %930 = vmatprep.mubr.msk.f32.mxu1 %vm1038_vm0, %v1037_v0  ;;  %v704_v36 = vld [vmem:[%s1269_s4 + $0xa0] sm:$0xff]  ;;  %v685_v55 = vld [vmem:[%s1269_s4 + $0x8] sm:$0xff] }
  0x2f   :  { %928 = vmatprep.subr.mxu1 %v1037_v0  ;;  %731 = vmatpush1.msra.mxu0 %v712_v28  ;;  %v700_v40 = vld [vmem:[%s1269_s4 + $0x80] sm:$0xff] }
  0x30   :  { %929 = vmatpush3.msra.mxu1 %v48_v11  ;;  %732 = vmatprep.subr.mxu0 %v711_v29  ;;  %v696_v44 = vld [vmem:[%s1269_s4 + $0x60] sm:$0xff] }
  0x31   :  { %931 = vmatmul.mubr.msk.f32.vlgmr.msra.gmra.mxu1 %vm66_vm1, %v294_v12  ;;  %933 = vmatprep.subr.mxu1 %v1037_v0  ;;  %v692_v48 = vld [vmem:[%s1269_s4 + $0x40] sm:$0xff] }
  0x32   :  { %934 = vmatpush3.msra.mxu1 %v51_v13  ;;  %937 = vmatprep.mubr.msk.f32.mxu1 %vm1038_vm0, %v1037_v0  ;;  %v688_v52 = vld [vmem:[%s1269_s4 + $0x20] sm:$0xff] }
  0x33   :  { %935 = vmatprep.subr.mxu1 %v1037_v0  ;;  %733 = vmatpush1.msra.mxu0 %v710_v30  ;;  %v684_v56 = vld [vmem:[%s1269_s4] sm:$0xff] }
  0x34   :  { %936 = vmatpush3.msra.mxu1 %v50_v14  ;;  %734 = vmatprep.subr.mxu0 %v709_v31  ;;  %v681_v14 = vld [vmem:[%s1268_s3] sm:$0x1]  ;;  %s1040_s3 = smov [#allocation7]  }
  0x35   :  { %938 = vmatmul.mubr.msk.f32.vlgmr.msra.gmra.mxu1 %vm66_vm1, %v372_v15  ;;  %940 = vmatprep.subr.mxu1 %v1037_v0 }
  0x36   :  { %941 = vmatpush3.msra.mxu1 %v53_v16  ;;  %944 = vmatprep.mubr.msk.f32.mxu1 %vm1038_vm0, %v1037_v0 }
  0x37   :  { %942 = vmatprep.subr.mxu1 %v1037_v0  ;;  %735 = vmatpush1.msra.mxu0 %v708_v32 }
  0x38   :  { %943 = vmatpush3.msra.mxu1 %v52_v17  ;;  %736 = vmatprep.subr.mxu0 %v707_v33 }
  0x39   :  { %945 = vmatmul.mubr.msk.f32.vlgmr.msra.gmra.mxu1 %vm66_vm1, %v450_v18  ;;  %947 = vmatprep.subr.mxu1 %v1037_v0 }
  0x3a   :  { %948 = vmatpush3.msra.mxu1 %v55_v19  ;;  %951 = vmatprep.mubr.msk.f32.mxu1 %vm1038_vm0, %v1037_v0  ;;  %v718_v19 = vlaneseq }
  0x3b   :  { %949 = vmatprep.subr.mxu1 %v1037_v0  ;;  %737 = vmatpush1.msra.mxu0 %v706_v34 }
  0x3c   :  { %950 = vmatpush3.msra.mxu1 %v54_v20  ;;  %738 = vmatprep.subr.mxu0 %v705_v35  ;;  %v719_v20 = vshrl.u32 %v718_v19, 7  ;;  %vm840_vm3 = vcmp.lt.s32.totalorder %v718_v19, 256 }
  0x3d   :  { %952 = vmatmul.mubr.msk.f32.vlgmr.msra.gmra.mxu1 %vm66_vm1, %v528_v21  ;;  %954 = vmatprep.subr.mxu1 %v1037_v0 }
  0x3e   :  { %955 = vmatpush3.msra.mxu1 %v57_v22  ;;  %958 = vmatprep.mubr.msk.f32.mxu1 %vm1038_vm0, %v1037_v0  ;;  %v720_v21 = vsub.s32 0, %v719_v20  ;;  %v716_v22 = vld [vmem:[%s1270_s5] sm:$0x3]  ;;  %s849_s5 = sshll.u32 %s1040_s3, 4  ;;  %s850_s5 = int_to_ptr.vmem [resolvable:$true] %s849_s5 }
  0x3f   :  { %956 = vmatprep.subr.mxu1 %v1037_v0  ;;  %739 = vmatpush1.msra.mxu0 %v704_v36  ;;  %s1007_s25 = scalar_lea.vmem %s850_s5, 32  ;;  %p1012_p11 = scmp.lt.s32.totalorder %s850_s5, %s850_s5 }
  0x40   :  { %957 = vmatpush3.msra.mxu1 %v56_v23  ;;  %740 = vmatprep.subr.mxu0 %v703_v37  ;;  %v724_v23 = vsub.s32 1, %v719_v20  ;;  %p1008_p10 = scmp.ne.s32.totalorder %s850_s5, %s1007_s25  ;;  %p1013_p12 = scmp.lt.s32.totalorder %s1007_s25, %s1007_s25 }
  0x41   :  { %959 = vmatmul.mubr.msk.f32.vlgmr.msra.gmra.mxu1 %vm66_vm1, %v606_v24  ;;  %741 = vmatpush1.msra.mxu0 %v702_v38  ;;  %v721_v24 = vrot.slane %v716_v22, %v720_v21 }
  0x42   :  { %742 = vmatprep.subr.mxu0 %v701_v39  ;;  %v725_v25 = vrot.slane %v716_v22, %v724_v23  ;;  %p1014_p13 = por %p1013_p12, %p1012_p11 }
  0x43   :  { %743 = vmatpush1.msra.mxu0 %v700_v40 }
  0x44   :  { %744 = vmatprep.subr.mxu0 %v699_v41  ;;  %p1015_p0 = pnand %p1014_p13, %p1008_p10 }
  0x45   :  { %745 = vmatpush1.msra.mxu0 %v698_v42 }
  0x46   :  { %746 = vmatprep.subr.mxu0 %v697_v43 }
  0x47   :  { %747 = vmatpush1.msra.mxu0 %v696_v44  ;;  %v1039_v44 = vmov 1966171168  }
  0x48   :  { %748 = vmatprep.subr.mxu0 %v695_v45  ;;  %v824_v45 = vunpack.c.l.s4 %v1039_v44 }
  0x49   :  { %749 = vmatpush1.msra.mxu0 %v694_v46 }
  0x4a   :  { %750 = vmatprep.subr.mxu0 %v693_v47  ;;  %v825_v46 = vunpack.c.0.s8 %v824_v45 }
  0x4b   :  { %751 = vmatpush1.msra.mxu0 %v692_v48 }
  0x4c   :  { %752 = vmatprep.subr.mxu0 %v691_v49 }
  0x4d   :  { %753 = vmatpush1.msra.mxu0 %v690_v50 }
  0x4e   :  { %754 = vmatprep.subr.mxu0 %v689_v51  ;;  %v828_v51 = vsub.s32 %v825_v46, %v719_v20 }
  0x4f   :  { %755 = vmatpush1.msra.mxu0 %v688_v52 }
  0x50   :  { %756 = vmatprep.subr.mxu0 %v687_v53 }
  0x51   :  { %757 = vmatpush1.msra.mxu0 %v686_v54 }
  0x52   :  { %758 = vmatprep.subr.mxu0 %v685_v55 }
  0x53   :  { %759 = vmatpush1.msra.mxu0 %v684_v56 }
  0xe5   :  { %v136_v57 = vpop.f32.mrf.mxu1 }
  0xe7   :  { %v911_v58 = vpop.f32.mrf.mxu1 }
  0xe9   :  { %v209_v59 = vpop.f32.mrf.mxu1 }
  0xea   :  { %v210_v2 = vadd.f32 %v209_v59, %v136_v57 }
  0xeb   :  { %v918_v60 = vpop.f32.mrf.mxu1 }
  0xed   :  { %v286_v61 = vpop.f32.mrf.mxu1 }
  0xee   :  { %v290_v4 = vadd.f32 %v286_v61, %v210_v2 }
  0xef   :  { %v925_v62 = vpop.f32.mrf.mxu1 }
  0xf1   :  { %v364_v63 = vpop.f32.mrf.mxu1 }
  0xf2   :  { %v368_v6 = vadd.f32 %v364_v63, %v290_v4 }
  0xf3   :  { %v932_v0 = vpop.f32.mrf.mxu1 }
  0xf5   :  { %v442_v1 = vpop.f32.mrf.mxu1 }
  0xf6   :  { %v446_v8 = vadd.f32 %v442_v1, %v368_v6 }
  0xf7   :  { %v939_v3 = vpop.f32.mrf.mxu1 }
  0xf9   :  { %v520_v5 = vpop.f32.mrf.mxu1 }
  0xfa   :  { %v524_v10 = vadd.f32 %v520_v5, %v446_v8 }
  0xfb   :  { %v946_v7 = vpop.f32.mrf.mxu1 }
  0xfd   :  { %v598_v9 = vpop.f32.mrf.mxu1 }
  0xfe   :  { %v602_v12 = vadd.f32 %v598_v9, %v524_v10 }
  0xff   :  { %v953_v11 = vpop.f32.mrf.mxu1 }
 0x101   :  { %v676_v13 = vpop.f32.mrf.mxu1 }
 0x102   :  { %v680_v15 = vadd.f32 %v676_v13, %v602_v12 }
 0x103   :  { %v960_v16 = vpop.f32.mrf.mxu1 }
 0x104   :  { %v682_v17 = vadd.f32 %v681_v14, %v680_v15 }
 0x106   :  { %v683_v18 = vmax.f32 %v682_v17, 0.0 }
 0x108   :  { %793 = vmatmul.mubr.f32.vlgmr.msra.gmra.mxu0 %v683_v18 }
 0x1c8   :  { %v794_v26 = vpop.f32.mrf.mxu0 }
 0x1c9   :  { %v795_v27 = vadd.f32 %v794_v26, %v721_v24 }
 0x1ca   :  { %v796_v28 = vpop.f32.mrf.mxu0 }
 0x1cb   :  { %v797_v29 = vadd.f32 %v796_v28, %v725_v25  ;;  %v800_v30 = vsel %vm799_vm2, %v795_v27, -inf }
 0x1cd   :  { %v801_v31 = vsel %vm799_vm2, %v797_v29, -inf }
 0x1ce   :  { %v802_v32 = vmax.f32 %v800_v30, %v801_v31 }
 0x1d0   :  { %803 = vmax.xlane.f32.xlu0 %v802_v32 }
 0x259   :  { %v804_v33 = vpop.xlane.xlu0 %803 }
 0x25a   :  { %v805_v34 = vsub.f32 %v795_v27, %v804_v33  ;;  %v806_v35 = vsub.f32 %v797_v29, %v804_v33 }
 0x25c   :  { %v807_v36 = vmul.f32 1.442695, %v805_v34  ;;  %v809_v37 = vmul.f32 1.442695, %v806_v35 }
 0x25e   :  { %969 = vpow2.f32 %v807_v36 }
 0x25f   :  { %971 = vpow2.f32 %v809_v37 }
 0x26b   :  { %v970_v38 = vpop.eup %969 }
 0x26c   :  { %v972_v39 = vpop.eup %971  ;;  %v811_v40 = vsel %vm799_vm2, %v970_v38, 0.0 }
 0x26d   :  { %v812_v41 = vsel %vm799_vm2, %v972_v39, 0.0 }
 0x26e   :  { %v813_v42 = vadd.f32 %v812_v41, %v811_v40 }
 0x270   :  { %814 = vadd.xlane.f32.xlu0 %v813_v42 }
 0x2f9   :  { %v815_v43 = vpop.xlane.xlu0 %814 }
 0x2fa   :  { %973 = vlog2.f32 %v815_v43 }
 0x307   :  { %v974_v47 = vpop.eup %973 }
 0x308   :  { %v817_v48 = vmul.f32 0.6931472, %v974_v47 }
 0x30a   :  { %v818_v49 = vsub.f32 %v805_v34, %v817_v48  ;;  %v819_v50 = vsub.f32 %v806_v35, %v817_v48 }
 0x30c   :  { %v822_v52 = vcombine.low %v818_v49, %v819_v50 }
 0x30e   :  { %v829_v53 = vrot.slane %v822_v52, %v828_v51 }
 0x310   :  { %v836_v54 = vrot.slane %v829_v53, %v828_v51 }
 0x312   :  { %842 = vst.msk [vmem:[#allocation7] sm:$0x3] %vm840_vm3, %v836_v54 }
 0x313   :  { %1018 = shalt.err (!%p1015_p0)
}
 0x314   :  { %852 = dma.vmem_to_hbm [thread:$0]  %s850_s5, 32, %s1271_s6, [#allocation6]  }
 0x315   :  { %1031 = dma.done.wait [#allocation6], 32  }
 0x316   :  { %1032 = vsyncadd [#allocation6], 4294967264 }
 0x317   :  { %856 = vsyncpa [#allocation5], 1 }
 0x318   :  { %857 = vsyncpa [#allocation6], 1 }

</bundles_post_ra>
